<compile_context>
chip_gen: v6e
topology: v6e:2x2x1
jax: 0.10.0
libtpu: 0.0.40
codegen_flags: <defaults>
</compile_context>

<pallas_src>
import jax
import jax.numpy as jnp
from jax.experimental import pallas as pl
from jax.experimental.pallas import tpu as pltpu


# ----------------------------- kernel -----------------------------


def _make_critic_kernel(d_in, h2, n_linear, bias_row, out_w):
    """Kernel computing both fused Q heads for one batch tile, f32 end-to-end."""

    def kernel(xa_ref, w_ref, out_ref):
        x = xa_ref[...]                                        # [Bt, d_in] f32

        # Layer 1: single matmul over the packed obs||action input.
        w = w_ref[0, :d_in, :h2]                               # [d_in, 2H]
        b = w_ref[0, bias_row:bias_row + 1, :h2]               # [1, 2H]
        h = jnp.dot(x, w, preferred_element_type=jnp.float32) + b
        h = jnp.maximum(h, 0.0)

        # Hidden layers 2..n_layers (block-diagonal fused heads).
        for l in range(1, n_linear - 1):
            w = w_ref[l, :h2, :h2]                             # [2H, 2H]
            b = w_ref[l, bias_row:bias_row + 1, :h2]           # [1, 2H]
            h = jnp.dot(h, w, preferred_element_type=jnp.float32) + b
            h = jnp.maximum(h, 0.0)

        # Output layer, padded to a lane-dense 128-wide slab (cols 0/1 = Q1/Q2).
        w = w_ref[n_linear - 1, :h2, :out_w]                   # [2H, 128]
        b = w_ref[n_linear - 1, bias_row:bias_row + 1, :out_w]  # [1, 128]
        y = jnp.dot(h, w, preferred_element_type=jnp.float32) + b
        out_ref[...] = y.astype(out_ref.dtype)

    return kernel


# ------------------------- param handling -------------------------


def init_critic_params(key, obs_dim, action_dim, n_layers, hidden_dim):
    """Synthetic init standing in for utils.weight_init (not part of forward())."""
    dims = [obs_dim + action_dim] + [hidden_dim] * n_layers + [1]
    params = {}
    for head in ("a", "b"):
        layers = []
        for i in range(len(dims) - 1):
            key, kw, kb = jax.random.split(key, 3)
            scale = float(dims[i]) ** -0.5
            w = scale * jax.random.normal(kw, (dims[i], dims[i + 1]), jnp.float32)
            b = 0.1 * jax.random.normal(kb, (1, dims[i + 1]), jnp.float32)
            layers.append((w, b))
        params[head] = layers
    return params


def pack_critic_params(params):
    """Fuse the two heads and stack every layer into ONE padded f32 buffer.

    Returns:
      stacked: [n_linear, max_in + 1, buf_cols] f32. For layer l the valid weight
               occupies rows [0, in_l) and cols [0, out_l); the bias lives in the
               last row (bias_row = max_in); everything else is exactly zero.
      meta:    static dims needed by the kernel factory / wrapper.
    """
    head_a, head_b = params["a"], params["b"]
    n_linear = len(head_a)
    d_in = head_a[0][0].shape[0]          # obs_dim + action_dim
    hidden = head_a[0][0].shape[1]        # hidden_dim
    h2 = 2 * hidden
    out_w = 128                           # lane-dense final slab width
    buf_cols = max(h2, out_w)
    max_in = max(d_in, h2)
    bias_row = max_in

    slabs = []
    for l in range(n_linear):
        wa, ba = head_a[l]
        wb, bb = head_b[l]
        if l == 0:
            # Heads concatenated along the output dim -> [d_in, 2H].
            w = jnp.concatenate([wa, wb], axis=1)
            b = jnp.concatenate([ba, bb], axis=1)
        else:
            # Block-diagonal fusion -> [2*in, 2*out].
            i_dim, o_dim = wa.shape
            w = jnp.zeros((2 * i_dim, 2 * o_dim), jnp.float32)
            w = w.at[:i_dim, :o_dim].set(wa).at[i_dim:, o_dim:].set(wb)
            b = jnp.concatenate([ba, bb], axis=1)
        slab = jnp.zeros((max_in + 1, buf_cols), jnp.float32)
        slab = slab.at[:w.shape[0], :w.shape[1]].set(w)
        slab = slab.at[bias_row, :b.shape[1]].set(b[0])
        slabs.append(slab)

    stacked = jnp.stack(slabs, axis=0)
    meta = dict(d_in=d_in, h2=h2, n_linear=n_linear,
                bias_row=bias_row, out_w=out_w, buf_cols=buf_cols)
    return stacked, meta


# --------------------------- forward -------------------------------


def _round_up(x, m):
    return ((x + m - 1) // m) * m


def _tile_batch(B, block_b):
    """Balanced batch tiles: one step for small B, near-equal tiles for large B."""
    n_tiles = max(1, -(-B // block_b))
    bt = _round_up(-(-B // n_tiles), 8)
    return bt, n_tiles * bt, n_tiles


def critic_forward(obs, action, stacked_params, meta, *, block_b=2048):
    """Pallas-backed Critic.forward. Returns (q1, q2), each [B, 1] float32."""
    assert obs.shape[0] == action.shape[0]
    B = obs.shape[0]
    d_in, h2 = meta["d_in"], meta["h2"]
    n_linear, out_w = meta["n_linear"], meta["out_w"]
    assert obs.shape[1] + action.shape[1] == d_in

    # Pack obs||action host-side -> one input DMA, one K=d_in layer-1 MXU push.
    xa = jnp.concatenate([obs.astype(jnp.float32),
                          action.astype(jnp.float32)], axis=1)

    bt, b_pad, n_tiles = _tile_batch(B, block_b)
    if b_pad != B:
        xa = jnp.pad(xa, ((0, b_pad - B), (0, 0)))

    kernel = _make_critic_kernel(d_in, h2, n_linear, meta["bias_row"], out_w)

    flops = 2 * b_pad * (d_in * h2 + (n_linear - 2) * h2 * h2 + h2 * out_w)
    bytes_accessed = 4 * (b_pad * d_in + int(stacked_params.size) + b_pad * out_w)

    out = pl.pallas_call(
        kernel,
        out_shape=jax.ShapeDtypeStruct((b_pad, out_w), jnp.float32),
        grid_spec=pl.GridSpec(
            grid=(n_tiles,),
            in_specs=[
                pl.BlockSpec((bt, d_in), lambda i: (i, 0)),
                # Full-array, constant index map -> weights stay VMEM-resident.
                pl.BlockSpec(stacked_params.shape, lambda i: (0, 0, 0)),
            ],
            out_specs=pl.BlockSpec((bt, out_w), lambda i: (i, 0)),
        ),
        compiler_params=pltpu.CompilerParams(
            dimension_semantics=("parallel",)),
        cost_estimate=pl.CostEstimate(flops=flops, transcendentals=0,
                                      bytes_accessed=bytes_accessed),
    )(xa, stacked_params)

    return out[:B, 0:1], out[:B, 1:2]


# --------------------------- reference ------------------------------


def critic_reference(obs, action, params):
    """Pure-JAX f32 reference matching the PyTorch module semantics."""
    x = jnp.concatenate([obs, action], axis=1).astype(jnp.float32)

    def qfn(layers):
        h = x
        for w, b in layers[:-1]:
            h = jnp.maximum(h @ w + b, 0.0)
        w, b = layers[-1]
        return h @ w + b

    return qfn(params["a"]), qfn(params["b"])


# ----------------------------- main ---------------------------------


if __name__ == "__main__":
    # Shapes implied by Critic.forward: obs [B, obs_dim], action [B, action_dim];
    # critic_params: n_layers=2, hidden_dim=32.
    B, obs_dim, action_dim, n_layers, hidden_dim = 128, 16, 8, 2, 32

    key = jax.random.PRNGKey(0)
    k_obs, k_act, k_par = jax.random.split(key, 3)
    obs = jax.random.normal(k_obs, (B, obs_dim), dtype=jnp.float32)
    action = jax.random.normal(k_act, (B, action_dim), dtype=jnp.float32)
    params = init_critic_params(k_par, obs_dim, action_dim, n_layers, hidden_dim)

    stacked, meta = pack_critic_params(params)
    q1, q2 = critic_forward(obs, action, stacked, meta)
    jax.block_until_ready((q1, q2))

    r1, r2 = critic_reference(obs, action, params)
    assert q1.shape == (B, 1) and q2.shape == (B, 1)
    # f32 end-to-end -> tight tolerance (only MXU f32-pass rounding differences).
    assert jnp.allclose(q1, r1, atol=2e-3, rtol=2e-3)
    assert jnp.allclose(q2, r2, atol=2e-3, rtol=2e-3)

    print("KERNEL_OK")
</pallas_src>

<mosaic_0001>
module attributes {stable_mosaic.version = 11 : i64} {
  func.func @kernel(%arg0: i32, %arg1: memref<128x24xf32, #tpu.memory_space<vmem>>, %arg2: memref<3x65x128xf32, #tpu.memory_space<vmem>>, %arg3: memref<128x128xf32, #tpu.memory_space<vmem>>) attributes {dimension_semantics = [#tpu.dimension_semantics<parallel>], iteration_bounds = array<i64: 1>, scalar_prefetch = 0 : i64, scratch_operands = 0 : i64, tpu.core_type = #tpu.core_type<tc>, window_params = [{transform_indices = @transform_0, window_bounds = array<i64: 128, 24>}, {pipeline_mode = #tpu.pipeline_mode<synchronous>, transform_indices = @transform_1, window_bounds = array<i64: 3, 65, 128>}, {transform_indices = @transform_2, window_bounds = array<i64: 128, 128>}]} {
    %c0 = arith.constant 0 : index
    %c0_0 = arith.constant 0 : index
    %0 = vector.load %arg1[%c0, %c0_0] : memref<128x24xf32, #tpu.memory_space<vmem>>, vector<128x24xf32>
    %c0_1 = arith.constant 0 : index
    %c0_2 = arith.constant 0 : index
    %c0_3 = arith.constant 0 : index
    %1 = vector.load %arg2[%c0_1, %c0_2, %c0_3] : memref<3x65x128xf32, #tpu.memory_space<vmem>>, vector<1x24x64xf32>
    %2 = vector.shape_cast %1 : vector<1x24x64xf32> to vector<24x64xf32>
    %c0_4 = arith.constant 0 : index
    %c64 = arith.constant 64 : index
    %c0_5 = arith.constant 0 : index
    %3 = vector.load %arg2[%c0_4, %c64, %c0_5] : memref<3x65x128xf32, #tpu.memory_space<vmem>>, vector<1x1x64xf32>
    %4 = vector.shape_cast %3 : vector<1x1x64xf32> to vector<1x64xf32>
    %cst = arith.constant dense<0.000000e+00> : vector<128x64xf32>
    %5 = tpu.matmul %0, %2, %cst {dimension_numbers = #tpu.dot_dimension_numbers<[1], [0], [0], [1], [0, 0, 1, 1], [], []>} : vector<128x24xf32>, vector<24x64xf32>, vector<128x64xf32> -> vector<128x64xf32>
    %6 = vector.broadcast %4 : vector<1x64xf32> to vector<128x64xf32>
    %7 = arith.addf %5, %6 : vector<128x64xf32>
    %cst_6 = arith.constant 0.000000e+00 : f32
    %8 = vector.broadcast %cst_6 : f32 to vector<128x64xf32>
    %9 = arith.maximumf %7, %8 : vector<128x64xf32>
    %c1 = arith.constant 1 : index
    %c0_7 = arith.constant 0 : index
    %c0_8 = arith.constant 0 : index
    %10 = vector.load %arg2[%c1, %c0_7, %c0_8] : memref<3x65x128xf32, #tpu.memory_space<vmem>>, vector<1x64x64xf32>
    %11 = vector.shape_cast %10 : vector<1x64x64xf32> to vector<64x64xf32>
    %c1_9 = arith.constant 1 : index
    %c64_10 = arith.constant 64 : index
    %c0_11 = arith.constant 0 : index
    %12 = vector.load %arg2[%c1_9, %c64_10, %c0_11] : memref<3x65x128xf32, #tpu.memory_space<vmem>>, vector<1x1x64xf32>
    %13 = vector.shape_cast %12 : vector<1x1x64xf32> to vector<1x64xf32>
    %cst_12 = arith.constant dense<0.000000e+00> : vector<128x64xf32>
    %14 = tpu.matmul %9, %11, %cst_12 {dimension_numbers = #tpu.dot_dimension_numbers<[1], [0], [0], [1], [0, 0, 1, 1], [], []>} : vector<128x64xf32>, vector<64x64xf32>, vector<128x64xf32> -> vector<128x64xf32>
    %15 = vector.broadcast %13 : vector<1x64xf32> to vector<128x64xf32>
    %16 = arith.addf %14, %15 : vector<128x64xf32>
    %cst_13 = arith.constant 0.000000e+00 : f32
    %17 = vector.broadcast %cst_13 : f32 to vector<128x64xf32>
    %18 = arith.maximumf %16, %17 : vector<128x64xf32>
    %c2 = arith.constant 2 : index
    %c0_14 = arith.constant 0 : index
    %c0_15 = arith.constant 0 : index
    %19 = vector.load %arg2[%c2, %c0_14, %c0_15] : memref<3x65x128xf32, #tpu.memory_space<vmem>>, vector<1x64x128xf32>
    %20 = vector.shape_cast %19 : vector<1x64x128xf32> to vector<64x128xf32>
    %c2_16 = arith.constant 2 : index
    %c64_17 = arith.constant 64 : index
    %c0_18 = arith.constant 0 : index
    %21 = vector.load %arg2[%c2_16, %c64_17, %c0_18] : memref<3x65x128xf32, #tpu.memory_space<vmem>>, vector<1x1x128xf32>
    %22 = vector.shape_cast %21 : vector<1x1x128xf32> to vector<1x128xf32>
    %cst_19 = arith.constant dense<0.000000e+00> : vector<128x128xf32>
    %23 = tpu.matmul %18, %20, %cst_19 {dimension_numbers = #tpu.dot_dimension_numbers<[1], [0], [0], [1], [0, 0, 1, 1], [], []>} : vector<128x64xf32>, vector<64x128xf32>, vector<128x128xf32> -> vector<128x128xf32>
    %24 = vector.broadcast %22 : vector<1x128xf32> to vector<128x128xf32>
    %25 = arith.addf %23, %24 : vector<128x128xf32>
    %c0_20 = arith.constant 0 : index
    %c0_21 = arith.constant 0 : index
    %26 = vector.load %arg3[%c0_20, %c0_21] : memref<128x128xf32, #tpu.memory_space<vmem>>, vector<128x128xf32>
    tpu.vector_store %arg3[%c0_20, %c0_21], %25 {strides = array<i32>} : memref<128x128xf32, #tpu.memory_space<vmem>>, vector<128x128xf32>,
    return
  }
  func.func @transform_0(%arg0: i32) -> (i32, i32) {
    %c0_i32 = arith.constant 0 : i32
    %c0_i32_0 = arith.constant 0 : i32
    return %arg0, %c0_i32 : i32, i32
  }
  func.func @transform_1(%arg0: i32) -> (i32, i32, i32) {
    %c0_i32 = arith.constant 0 : i32
    %c0_i32_0 = arith.constant 0 : i32
    %c0_i32_1 = arith.constant 0 : i32
    %c0_i32_2 = arith.constant 0 : i32
    return %c0_i32, %c0_i32_0, %c0_i32_1 : i32, i32, i32
  }
  func.func @transform_2(%arg0: i32) -> (i32, i32) {
    %c0_i32 = arith.constant 0 : i32
    %c0_i32_0 = arith.constant 0 : i32
    return %arg0, %c0_i32 : i32, i32
  }
}

</mosaic_0001>

<bundles_post_ra>
// kernel: tpu_custom_call.1
= control target key start
LH: loop header
LB: loop body
LE: loop exit
PB: predicated region body
PF: predicated region fallthrough
CT: control target
= control target key end

     0   :  { %7 = vsyncpa [#allocation3], 0  ;;  %s1133_s0 = inlined_call_operand.vmem [shape: f32[128,24], index: 0, kind: input, shape index: {}]   ;;  %s1134_s1 = inlined_call_operand.hbm [shape: f32[3,65,128], index: 1, kind: input, shape index: {}]   ;;  %s1135_s2 = inlined_call_operand.hbm [shape: f32[128,128], index: 2, kind: output, shape index: {}]  }
   0x1   :  { %8 = vsyncpa [#allocation4], 0  ;;  %s1006_s9 = smov [#allocation2]  }
   0x2   :  { %s16_s10 = sshll.u32 %s1006_s9, 4  ;;  %s17_s10 = int_to_ptr.vmem [resolvable:$true] %s16_s10 }
   0x3   :  { %s970_s11 = scalar_lea.vmem %s17_s10, 3456  ;;  %p975_p1 = scmp.lt.s32.totalorder %s17_s10, %s17_s10 }
   0x4   :  { %p971_p0 = scmp.ne.s32.totalorder %s17_s10, %s970_s11  ;;  %p976_p2 = scmp.lt.s32.totalorder %s970_s11, %s970_s11 }
   0x6   :  { %p977_p3 = por %p976_p2, %p975_p1 }
   0x8   :  { %p978_p4 = pnand %p977_p3, %p971_p0 }
   0xa   :  { %981 = shalt.err (!%p978_p4)
}
   0xb   :  { %s1007_s12 = smov 128   ;;  %s1008_s13 = smov 8  }
   0xc   :  { %22 = dma.hbm_to_vmem [thread:$0]  %s1134_s1, 3456, %s17_s10, [#allocation3], %s1007_s12, %s1007_s12, %s1008_s13  }
   0xd   :  { %1002 = dma.done.wait [#allocation3], 3456  }
   0xe   :  { %1003 = vsyncadd [#allocation3], 4294963840  ;;  %vm50_vm0 = vcmask 195584   ;;  %v44_v0 = vld [vmem:[#allocation2 + $0x10] sm:$0xff]  ;;  %v43_v1 = vld [vmem:[#allocation2 + $0x8] sm:$0xff]  ;;  %vm274_vm1 = vcmask 523264  }
   0xf   :  { %842 = vmatprep.subr.mxu0 %v44_v0  ;;  %v26_v2 = vld [vmem:[%s1133_s0] sm:$0xff]  ;;  %952 = vmatprep.subr.mxu1 %v44_v0  ;;  %v27_v4 = vld [vmem:[%s1133_s0 + $0x8] sm:$0xff]  ;;  %v28_v5 = vld [vmem:[%s1133_s0 + $0x10] sm:$0xff] }
  0x10   :  { %843 = vmatpush3.msra.mxu0 %v44_v0  ;;  %v42_v3 = vld [vmem:[#allocation2] sm:$0xff]  ;;  %848 = vmatprep.mubr.msk.f32.mxu0 %vm50_vm0, %v26_v2  ;;  %v35_v7 = vld [vmem:[%s1133_s0 + $0x48] sm:$0xff]  ;;  %v36_v9 = vld [vmem:[%s1133_s0 + $0x50] sm:$0xff] }
  0x11   :  { %844 = vmatprep.subr.mxu0 %v43_v1  ;;  %955 = vmatpush3.msra.mxu1 %v44_v0  ;;  %v34_v6 = vld [vmem:[%s1133_s0 + $0x40] sm:$0xff]  ;;  %v29_v10 = vld [vmem:[%s1133_s0 + $0x18] sm:$0xff]  ;;  %v266_v14 = vld [vmem:[#allocation2 + $0x70] sm:$0xff] }
  0x12   :  { %845 = vmatpush3.msra.mxu0 %v43_v1  ;;  %953 = vmatprep.subr.mxu1 %v43_v1  ;;  %v268_v8 = vld [vmem:[#allocation2 + $0x80] sm:$0xff]  ;;  %v267_v11 = vld [vmem:[#allocation2 + $0x78] sm:$0xff]  ;;  %v31_v16 = vld [vmem:[%s1133_s0 + $0x28] sm:$0xff] }
  0x13   :  { %846 = vmatprep.subr.mxu0 %v42_v3  ;;  %956 = vmatpush3.msra.mxu1 %v43_v1  ;;  %v30_v12 = vld [vmem:[%s1133_s0 + $0x20] sm:$0xff]  ;;  %v37_v13 = vld [vmem:[%s1133_s0 + $0x58] sm:$0xff]  ;;  %v265_v17 = vld [vmem:[#allocation2 + $0x68] sm:$0xff] }
  0x14   :  { %847 = vmatpush3.msra.mxu0 %v42_v3  ;;  %954 = vmatprep.subr.mxu1 %v42_v3  ;;  %v38_v15 = vld [vmem:[%s1133_s0 + $0x60] sm:$0xff]  ;;  %v32_v18 = vld [vmem:[%s1133_s0 + $0x30] sm:$0xff]  ;;  %v39_v19 = vld [vmem:[%s1133_s0 + $0x68] sm:$0xff] }
  0x15   :  { %849 = vmatmul.mubr.msk.f32.vlgmr.msra.gmra.mxu0 %vm50_vm0, %v27_v4  ;;  %957 = vmatpush3.msra.mxu1 %v42_v3  ;;  %v264_v20 = vld [vmem:[#allocation2 + $0x60] sm:$0xff]  ;;  %v40_v21 = vld [vmem:[%s1133_s0 + $0x70] sm:$0xff]  ;;  %v33_v22 = vld [vmem:[%s1133_s0 + $0x38] sm:$0xff] }
  0x16   :  { %851 = vmatprep.mubr.msk.f32.mxu0 %vm50_vm0, %v28_v5  ;;  %860 = vmatprep.mubr.msk.f32.mxu1 %vm50_vm0, %v34_v6  ;;  %v41_v23 = vld [vmem:[%s1133_s0 + $0x78] sm:$0xff]  ;;  %v262_v25 = vld [vmem:[#allocation2 + $0x50] sm:$0xff]  ;;  %v261_v26 = vld [vmem:[#allocation2 + $0x48] sm:$0xff]  ;;  %s1009_s0 = smov [#allocation5]  }
  0x17   :  { %861 = vmatmul.mubr.msk.f32.vlgmr.msra.gmra.mxu1 %vm50_vm0, %v35_v7  ;;  %872 = vmatprep.subr.mxu1 %v268_v8  ;;  %v263_v24 = vld [vmem:[#allocation2 + $0x58] sm:$0xff]  ;;  %v492_v27 = vld [vmem:[#allocation2 + $0xc8] sm:$0xff]  ;;  %v491_v28 = vld [vmem:[#allocation2 + $0xc0] sm:$0xff]  ;;  %s712_s20 = sshll.u32 %s1009_s0, 4  ;;  %s713_s20 = int_to_ptr.vmem [resolvable:$true] %s712_s20 }
  0x18   :  { %863 = vmatprep.mubr.msk.f32.mxu1 %vm50_vm0, %v36_v9  ;;  %873 = vmatpush3.msra.mxu1 %v268_v8  ;;  %v490_v29 = vld [vmem:[#allocation2 + $0xb8] sm:$0xff]  ;;  %v489_v30 = vld [vmem:[#allocation2 + $0xb0] sm:$0xff]  ;;  %v488_v31 = vld [vmem:[#allocation2 + $0xa8] sm:$0xff]  ;;  %s982_s21 = scalar_lea.vmem %s713_s20, 2048  ;;  %p987_p6 = scmp.lt.s32.totalorder %s713_s20, %s713_s20 }
  0x19   :  { %852 = vmatmul.mubr.msk.f32.gmra.mxu0 %vm50_vm0, %v29_v10  ;;  %874 = vmatprep.subr.mxu1 %v267_v11  ;;  %v724_v32 = vld [vmem:[#allocation2 + $0x40] ss:$0 sm:$0xff]  ;;  %p983_p5 = scmp.ne.s32.totalorder %s713_s20, %s982_s21  ;;  %p988_p7 = scmp.lt.s32.totalorder %s982_s21, %s982_s21 }
  0x1a   :  { %854 = vmatprep.mubr.msk.f32.mxu0 %vm50_vm0, %v30_v12  ;;  %875 = vmatpush3.msra.mxu1 %v267_v11 }
  0x1b   :  { %864 = vmatmul.mubr.msk.f32.gmra.mxu1 %vm50_vm0, %v37_v13  ;;  %876 = vmatprep.subr.mxu1 %v266_v14  ;;  %p989_p8 = por %p988_p7, %p987_p6 }
  0x1c   :  { %866 = vmatprep.mubr.msk.f32.mxu1 %vm50_vm0, %v38_v15  ;;  %877 = vmatpush3.msra.mxu1 %v266_v14 }
  0x1d   :  { %855 = vmatmul.mubr.msk.f32.gmra.mxu0 %vm50_vm0, %v31_v16  ;;  %878 = vmatprep.subr.mxu1 %v265_v17  ;;  %p990_p9 = pnand %p989_p8, %p983_p5 }
  0x1e   :  { %857 = vmatprep.mubr.msk.f32.mxu0 %vm50_vm0, %v32_v18  ;;  %879 = vmatpush3.msra.mxu1 %v265_v17  ;;  %v487_v17 = vld [vmem:[#allocation2 + $0xa0] sm:$0xff]  ;;  %v486_v18 = vld [vmem:[#allocation2 + $0x98] sm:$0xff] }
  0x1f   :  { %867 = vmatmul.mubr.msk.f32.gmra.mxu1 %vm50_vm0, %v39_v19  ;;  %880 = vmatprep.subr.mxu1 %v264_v20  ;;  %v485_v19 = vld [vmem:[#allocation2 + $0x90] sm:$0xff] }
  0x20   :  { %869 = vmatprep.mubr.msk.f32.mxu1 %vm50_vm0, %v40_v21  ;;  %881 = vmatpush3.msra.mxu1 %v264_v20  ;;  %v741_v20 = vld [vmem:[#allocation2 + $0x88] ss:$0 sm:$0xff] }
  0x21   :  { %858 = vmatmul.mubr.msk.f32.gmra.mxu0 %vm50_vm0, %v33_v22  ;;  %882 = vmatprep.subr.mxu1 %v263_v24 }
  0x22   :  { %883 = vmatpush3.msra.mxu1 %v263_v24  ;;  %912 = vmatprep.subr.mxu0 %v492_v27 }
  0x23   :  { %870 = vmatmul.mubr.msk.f32.gmra.mxu1 %vm50_vm0, %v41_v23  ;;  %884 = vmatprep.subr.mxu1 %v262_v25 }
  0x24   :  { %885 = vmatpush3.msra.mxu1 %v262_v25  ;;  %913 = vmatpush3.msra.mxu0 %v492_v27 }
  0x25   :  { %886 = vmatprep.subr.mxu1 %v261_v26  ;;  %914 = vmatprep.subr.mxu0 %v491_v28 }
  0x26   :  { %887 = vmatpush3.msra.mxu1 %v261_v26  ;;  %915 = vmatpush3.msra.mxu0 %v491_v28 }
  0x27   :  { %916 = vmatprep.subr.mxu0 %v490_v29 }
  0x28   :  { %917 = vmatpush3.msra.mxu0 %v490_v29 }
  0x29   :  { %918 = vmatprep.subr.mxu0 %v489_v30 }
  0x2a   :  { %919 = vmatpush3.msra.mxu0 %v489_v30 }
  0x2b   :  { %920 = vmatprep.subr.mxu0 %v488_v31 }
  0x2c   :  { %921 = vmatpush3.msra.mxu0 %v488_v31 }
  0x2d   :  { %922 = vmatprep.subr.mxu0 %v487_v17 }
  0x2e   :  { %923 = vmatpush3.msra.mxu0 %v487_v17 }
  0x2f   :  { %924 = vmatprep.subr.mxu0 %v486_v18 }
  0x30   :  { %925 = vmatpush3.msra.mxu0 %v486_v18 }
  0x31   :  { %926 = vmatprep.subr.mxu0 %v485_v19 }
  0x32   :  { %927 = vmatpush3.msra.mxu0 %v485_v19 }
  0xd5   :  { %v850_v33 = vpop.f32.mrf.mxu0 }
  0xd6   :  { %v171_v34 = vadd.f32 %v850_v33, %v724_v32 }
  0xd7   :  { %v165_v35 = vpop.f32.mrf.mxu0  ;;  %v862_v36 = vpop.f32.mrf.mxu1 }
  0xd8   :  { %v166_v37 = vadd.f32 %v724_v32, %v165_v35  ;;  %v245_v41 = vmax.f32 %v171_v34, 0.0  ;;  %v211_v2 = vadd.f32 %v862_v36, %v724_v32 }
  0xd9   :  { %v853_v38 = vpop.f32.mrf.mxu0  ;;  %v205_v39 = vpop.f32.mrf.mxu1 }
  0xda   :  { %v244_v40 = vmax.f32 %v166_v37, 0.0  ;;  %v181_v42 = vadd.f32 %v853_v38, %v724_v32  ;;  %v206_v56 = vadd.f32 %v724_v32, %v205_v39  ;;  %v253_v6 = vmax.f32 %v211_v2, 0.0 }
  0xdb   :  { %v175_v43 = vpop.f32.mrf.mxu0  ;;  %v865_v44 = vpop.f32.mrf.mxu1 }
  0xdc   :  { %v176_v45 = vadd.f32 %v724_v32, %v175_v43  ;;  %888 = vmatprep.mubr.msk.f32.mxu1 %vm274_vm1, %v244_v40  ;;  %v247_v49 = vmax.f32 %v181_v42, 0.0  ;;  %v252_v63 = vmax.f32 %v206_v56, 0.0  ;;  %v221_v7 = vadd.f32 %v865_v44, %v724_v32 }
  0xdd   :  { %v856_v46 = vpop.f32.mrf.mxu0  ;;  %889 = vmatmul.mubr.msk.f32.vlgmr.msra.gmra.mxu1 %vm274_vm1, %v245_v41  ;;  %v215_v47 = vpop.f32.mrf.mxu1 }
  0xde   :  { %v246_v48 = vmax.f32 %v176_v45, 0.0  ;;  %v191_v50 = vadd.f32 %v856_v46, %v724_v32  ;;  %v216_v0 = vadd.f32 %v724_v32, %v215_v47  ;;  %v255_v11 = vmax.f32 %v221_v7, 0.0 }
  0xdf   :  { %v185_v51 = vpop.f32.mrf.mxu0  ;;  %v868_v52 = vpop.f32.mrf.mxu1 }
  0xe0   :  { %v186_v53 = vadd.f32 %v724_v32, %v185_v51  ;;  %891 = vmatprep.mubr.msk.f32.mxu1 %vm274_vm1, %v246_v48  ;;  %v249_v57 = vmax.f32 %v191_v50, 0.0  ;;  %v254_v4 = vmax.f32 %v216_v0, 0.0  ;;  %v231_v12 = vadd.f32 %v868_v52, %v724_v32 }
  0xe1   :  { %v859_v54 = vpop.f32.mrf.mxu0  ;;  %892 = vmatmul.mubr.msk.f32.gmra.mxu1 %vm274_vm1, %v247_v49  ;;  %v225_v60 = vpop.f32.mrf.mxu1 }
  0xe2   :  { %v248_v55 = vmax.f32 %v186_v53, 0.0  ;;  %v201_v58 = vadd.f32 %v859_v54, %v724_v32  ;;  %v226_v5 = vadd.f32 %v724_v32, %v225_v60  ;;  %v257_v14 = vmax.f32 %v231_v12, 0.0 }
  0xe3   :  { %v195_v59 = vpop.f32.mrf.mxu0  ;;  %v871_v3 = vpop.f32.mrf.mxu1 }
  0xe4   :  { %v196_v61 = vadd.f32 %v724_v32, %v195_v59  ;;  %894 = vmatprep.mubr.msk.f32.mxu1 %vm274_vm1, %v248_v55  ;;  %v251_v1 = vmax.f32 %v201_v58, 0.0  ;;  %v256_v9 = vmax.f32 %v226_v5, 0.0  ;;  %v241_v15 = vadd.f32 %v871_v3, %v724_v32  ;;  %v758_v5 = vld [vmem:[#allocation2 + $0xd0] ss:$0 sm:$0xff] }
  0xe5   :  { %895 = vmatmul.mubr.msk.f32.gmra.mxu1 %vm274_vm1, %v249_v57  ;;  %v235_v8 = vpop.f32.mrf.mxu1 }
  0xe6   :  { %v250_v62 = vmax.f32 %v196_v61, 0.0  ;;  %v236_v10 = vadd.f32 %v724_v32, %v235_v8  ;;  %v259_v16 = vmax.f32 %v241_v15, 0.0 }
  0xe8   :  { %897 = vmatprep.mubr.msk.f32.mxu1 %vm274_vm1, %v250_v62  ;;  %v258_v13 = vmax.f32 %v236_v10, 0.0 }
  0xe9   :  { %898 = vmatmul.mubr.msk.f32.gmra.mxu1 %vm274_vm1, %v251_v1 }
  0xea   :  { %900 = vmatprep.mubr.msk.f32.mxu1 %vm274_vm1, %v252_v63 }
  0xed   :  { %901 = vmatmul.mubr.msk.f32.gmra.mxu1 %vm274_vm1, %v253_v6 }
  0xee   :  { %903 = vmatprep.mubr.msk.f32.mxu1 %vm274_vm1, %v254_v4 }
  0xf1   :  { %904 = vmatmul.mubr.msk.f32.gmra.mxu1 %vm274_vm1, %v255_v11 }
  0xf2   :  { %906 = vmatprep.mubr.msk.f32.mxu1 %vm274_vm1, %v256_v9 }
  0xf5   :  { %907 = vmatmul.mubr.msk.f32.gmra.mxu1 %vm274_vm1, %v257_v14 }
  0xf6   :  { %909 = vmatprep.mubr.msk.f32.mxu1 %vm274_vm1, %v258_v13 }
  0xf9   :  { %910 = vmatmul.mubr.msk.f32.gmra.mxu1 %vm274_vm1, %v259_v16 }
 0x19d   :  { %v890_v21 = vpop.f32.mrf.mxu1 }
 0x19e   :  { %v395_v22 = vadd.f32 %v890_v21, %v741_v20 }
 0x19f   :  { %v389_v23 = vpop.f32.mrf.mxu1 }
 0x1a0   :  { %v390_v24 = vadd.f32 %v741_v20, %v389_v23  ;;  %v469_v27 = vmax.f32 %v395_v22, 0.0 }
 0x1a1   :  { %v893_v25 = vpop.f32.mrf.mxu1 }
 0x1a2   :  { %v468_v26 = vmax.f32 %v390_v24, 0.0  ;;  %v405_v28 = vadd.f32 %v893_v25, %v741_v20 }
 0x1a3   :  { %v399_v29 = vpop.f32.mrf.mxu1 }
 0x1a4   :  { %v400_v30 = vadd.f32 %v741_v20, %v399_v29  ;;  %928 = vmatprep.mubr.msk.f32.mxu0 %vm274_vm1, %v468_v26  ;;  %v471_v33 = vmax.f32 %v405_v28, 0.0 }
 0x1a5   :  { %v896_v31 = vpop.f32.mrf.mxu1  ;;  %929 = vmatmul.mubr.msk.f32.vlgmr.msra.gmra.mxu0 %vm274_vm1, %v469_v27 }
 0x1a6   :  { %v470_v32 = vmax.f32 %v400_v30, 0.0  ;;  %v415_v34 = vadd.f32 %v896_v31, %v741_v20 }
 0x1a7   :  { %v409_v35 = vpop.f32.mrf.mxu1 }
 0x1a8   :  { %v410_v36 = vadd.f32 %v741_v20, %v409_v35  ;;  %931 = vmatprep.mubr.msk.f32.mxu0 %vm274_vm1, %v470_v32  ;;  %v473_v39 = vmax.f32 %v415_v34, 0.0 }
 0x1a9   :  { %v899_v37 = vpop.f32.mrf.mxu1  ;;  %932 = vmatmul.mubr.msk.f32.gmra.mxu0 %vm274_vm1, %v471_v33 }
 0x1aa   :  { %v472_v38 = vmax.f32 %v410_v36, 0.0  ;;  %v425_v40 = vadd.f32 %v899_v37, %v741_v20 }
 0x1ab   :  { %v419_v41 = vpop.f32.mrf.mxu1 }
 0x1ac   :  { %v420_v42 = vadd.f32 %v741_v20, %v419_v41  ;;  %934 = vmatprep.mubr.msk.f32.mxu0 %vm274_vm1, %v472_v38  ;;  %v475_v45 = vmax.f32 %v425_v40, 0.0 }
 0x1ad   :  { %v902_v43 = vpop.f32.mrf.mxu1  ;;  %935 = vmatmul.mubr.msk.f32.gmra.mxu0 %vm274_vm1, %v473_v39 }
 0x1ae   :  { %v474_v44 = vmax.f32 %v420_v42, 0.0  ;;  %v435_v46 = vadd.f32 %v902_v43, %v741_v20 }
 0x1af   :  { %v429_v47 = vpop.f32.mrf.mxu1 }
 0x1b0   :  { %v430_v48 = vadd.f32 %v741_v20, %v429_v47  ;;  %937 = vmatprep.mubr.msk.f32.mxu0 %vm274_vm1, %v474_v44  ;;  %v477_v51 = vmax.f32 %v435_v46, 0.0 }
 0x1b1   :  { %v905_v49 = vpop.f32.mrf.mxu1  ;;  %938 = vmatmul.mubr.msk.f32.gmra.mxu0 %vm274_vm1, %v475_v45 }
 0x1b2   :  { %v476_v50 = vmax.f32 %v430_v48, 0.0  ;;  %v445_v52 = vadd.f32 %v905_v49, %v741_v20 }
 0x1b3   :  { %v439_v53 = vpop.f32.mrf.mxu1 }
 0x1b4   :  { %v440_v54 = vadd.f32 %v741_v20, %v439_v53  ;;  %940 = vmatprep.mubr.msk.f32.mxu0 %vm274_vm1, %v476_v50  ;;  %v479_v57 = vmax.f32 %v445_v52, 0.0 }
 0x1b5   :  { %v908_v55 = vpop.f32.mrf.mxu1  ;;  %941 = vmatmul.mubr.msk.f32.gmra.mxu0 %vm274_vm1, %v477_v51 }
 0x1b6   :  { %v478_v56 = vmax.f32 %v440_v54, 0.0  ;;  %v455_v58 = vadd.f32 %v908_v55, %v741_v20 }
 0x1b7   :  { %v449_v59 = vpop.f32.mrf.mxu1 }
 0x1b8   :  { %v450_v60 = vadd.f32 %v741_v20, %v449_v59  ;;  %943 = vmatprep.mubr.msk.f32.mxu0 %vm274_vm1, %v478_v56  ;;  %v481_v63 = vmax.f32 %v455_v58, 0.0 }
 0x1b9   :  { %v911_v61 = vpop.f32.mrf.mxu1  ;;  %944 = vmatmul.mubr.msk.f32.gmra.mxu0 %vm274_vm1, %v479_v57 }
 0x1ba   :  { %v480_v62 = vmax.f32 %v450_v60, 0.0  ;;  %v465_v0 = vadd.f32 %v911_v61, %v741_v20 }
 0x1bb   :  { %v459_v1 = vpop.f32.mrf.mxu1 }
 0x1bc   :  { %v460_v2 = vadd.f32 %v741_v20, %v459_v1  ;;  %946 = vmatprep.mubr.msk.f32.mxu0 %vm274_vm1, %v480_v62  ;;  %v483_v4 = vmax.f32 %v465_v0, 0.0 }
 0x1bd   :  { %947 = vmatmul.mubr.msk.f32.gmra.mxu0 %vm274_vm1, %v481_v63 }
 0x1be   :  { %v482_v3 = vmax.f32 %v460_v2, 0.0 }
 0x1c0   :  { %949 = vmatprep.mubr.msk.f32.mxu0 %vm274_vm1, %v482_v3 }
 0x1c1   :  { %950 = vmatmul.mubr.msk.f32.gmra.mxu0 %vm274_vm1, %v483_v4 }
 0x265   :  { %v930_v6 = vpop.f32.mrf.mxu0 }
 0x266   :  { %v618_v7 = vadd.f32 %v930_v6, %v758_v5 }
 0x267   :  { %v612_v8 = vpop.f32.mrf.mxu0 }
 0x268   :  { %692 = vst [vmem:[#allocation5 + $0x8] sm:$0xff] %v618_v7  ;;  %v613_v9 = vadd.f32 %v758_v5, %v612_v8 }
 0x269   :  { %v933_v10 = vpop.f32.mrf.mxu0 }
 0x26a   :  { %691 = vst [vmem:[#allocation5] sm:$0xff] %v613_v9  ;;  %v628_v11 = vadd.f32 %v933_v10, %v758_v5 }
 0x26b   :  { %v622_v12 = vpop.f32.mrf.mxu0 }
 0x26c   :  { %694 = vst [vmem:[#allocation5 + $0x18] sm:$0xff] %v628_v11  ;;  %v623_v13 = vadd.f32 %v758_v5, %v622_v12 }
 0x26d   :  { %v936_v14 = vpop.f32.mrf.mxu0 }
 0x26e   :  { %693 = vst [vmem:[#allocation5 + $0x10] sm:$0xff] %v623_v13  ;;  %v638_v15 = vadd.f32 %v936_v14, %v758_v5 }
 0x26f   :  { %v632_v16 = vpop.f32.mrf.mxu0 }
 0x270   :  { %696 = vst [vmem:[#allocation5 + $0x28] sm:$0xff] %v638_v15  ;;  %v633_v17 = vadd.f32 %v758_v5, %v632_v16 }
 0x271   :  { %v939_v18 = vpop.f32.mrf.mxu0 }
 0x272   :  { %695 = vst [vmem:[#allocation5 + $0x20] sm:$0xff] %v633_v17  ;;  %v648_v19 = vadd.f32 %v939_v18, %v758_v5 }
 0x273   :  { %v642_v20 = vpop.f32.mrf.mxu0 }
 0x274   :  { %698 = vst [vmem:[#allocation5 + $0x38] sm:$0xff] %v648_v19  ;;  %v643_v21 = vadd.f32 %v758_v5, %v642_v20 }
 0x275   :  { %v942_v22 = vpop.f32.mrf.mxu0 }
 0x276   :  { %697 = vst [vmem:[#allocation5 + $0x30] sm:$0xff] %v643_v21  ;;  %v658_v23 = vadd.f32 %v942_v22, %v758_v5 }
 0x277   :  { %v652_v24 = vpop.f32.mrf.mxu0 }
 0x278   :  { %700 = vst [vmem:[#allocation5 + $0x48] sm:$0xff] %v658_v23  ;;  %v653_v25 = vadd.f32 %v758_v5, %v652_v24 }
 0x279   :  { %v945_v26 = vpop.f32.mrf.mxu0 }
 0x27a   :  { %699 = vst [vmem:[#allocation5 + $0x40] sm:$0xff] %v653_v25  ;;  %v668_v27 = vadd.f32 %v945_v26, %v758_v5 }
 0x27b   :  { %v662_v28 = vpop.f32.mrf.mxu0 }
 0x27c   :  { %702 = vst [vmem:[#allocation5 + $0x58] sm:$0xff] %v668_v27  ;;  %v663_v29 = vadd.f32 %v758_v5, %v662_v28 }
 0x27d   :  { %v948_v30 = vpop.f32.mrf.mxu0 }
 0x27e   :  { %701 = vst [vmem:[#allocation5 + $0x50] sm:$0xff] %v663_v29  ;;  %v678_v31 = vadd.f32 %v948_v30, %v758_v5 }
 0x27f   :  { %v672_v32 = vpop.f32.mrf.mxu0 }
 0x280   :  { %704 = vst [vmem:[#allocation5 + $0x68] sm:$0xff] %v678_v31  ;;  %v673_v33 = vadd.f32 %v758_v5, %v672_v32 }
 0x281   :  { %v951_v34 = vpop.f32.mrf.mxu0 }
 0x282   :  { %703 = vst [vmem:[#allocation5 + $0x60] sm:$0xff] %v673_v33  ;;  %v688_v35 = vadd.f32 %v951_v34, %v758_v5 }
 0x283   :  { %v682_v36 = vpop.f32.mrf.mxu0 }
 0x284   :  { %706 = vst [vmem:[#allocation5 + $0x78] sm:$0xff] %v688_v35  ;;  %v683_v37 = vadd.f32 %v758_v5, %v682_v36 }
 0x286   :  { %705 = vst [vmem:[#allocation5 + $0x70] sm:$0xff] %v683_v37 }
 0x287   :  { %993 = shalt.err (!%p990_p9)
}
 0x288   :  { %718 = dma.vmem_to_hbm [thread:$0]  %s713_s20, 2048, %s1135_s2, [#allocation4], %s1007_s12, %s1007_s12, %s1008_s13  }
 0x289   :  { %1004 = dma.done.wait [#allocation4], 2048  }
 0x28a   :  { %1005 = vsyncadd [#allocation4], 4294965248 }
 0x28b   :  { %722 = vsyncpa [#allocation3], 1 }
 0x28c   :  { %723 = vsyncpa [#allocation4], 1 }

</bundles_post_ra>
